<compile_context>
chip_gen: v7x
topology: tpu7x:2x2x1
jax: 0.10.0
libtpu: 0.0.40
codegen_flags: <defaults>
</compile_context>

<pallas_src>
import functools
import math

import jax
import jax.numpy as jnp
from jax.experimental import pallas as pl
from jax.experimental.pallas import tpu as pltpu


# ----------------------------------------------------------------------------
# helpers
# ----------------------------------------------------------------------------
def _round_up(x, m):
    return ((x + m - 1) // m) * m


def _pad_rows(a, m_pad):
    m = a.shape[0]
    if m == m_pad:
        return a
    return jnp.pad(a, ((0, m_pad - m),) + ((0, 0),) * (a.ndim - 1))


# ----------------------------------------------------------------------------
# 1. fused RMSNorm (+ inv_linear_scale fold) + q/k/v projection
# ----------------------------------------------------------------------------
def _norm_qkv_kernel(x_ref, lnw_ref, wq_ref, wk_ref, wv_ref,
                     q_ref, k_ref, v_ref, *, eps, out_scale):
    xf = x_ref[...].astype(jnp.float32)
    var = jnp.mean(xf * xf, axis=-1, keepdims=True)
    h = xf * jax.lax.rsqrt(var + eps)
    # inv_linear_scale folded here: (h * s) @ W == (h @ W) * s
    h = (h * lnw_ref[...].astype(jnp.float32) * out_scale).astype(x_ref.dtype)
    q_ref[...] = jnp.dot(h, wq_ref[...],
                         preferred_element_type=jnp.float32).astype(q_ref.dtype)
    k_ref[...] = jnp.dot(h, wk_ref[...],
                         preferred_element_type=jnp.float32).astype(k_ref.dtype)
    v_ref[...] = jnp.dot(h, wv_ref[...],
                         preferred_element_type=jnp.float32).astype(v_ref.dtype)


def norm_qkv_proj(x2d, ln_w, wq_t, wk_t, wv_t, *, eps, out_scale, tm):
    # NOTE: at these cfg sizes the q/k/v weights are small and fully VMEM
    # resident; production sizes would output-tile them like the MLP kernel.
    M, K = x2d.shape
    Kq = wq_t.shape[1]
    Kkv = wk_t.shape[1]
    tm_eff = min(tm, _round_up(M, 16))
    m_pad = _round_up(M, tm_eff)
    xp = _pad_rows(x2d, m_pad)
    lnw2 = ln_w.reshape(1, K)
    q, k, v = pl.pallas_call(
        functools.partial(_norm_qkv_kernel, eps=eps, out_scale=out_scale),
        out_shape=(
            jax.ShapeDtypeStruct((m_pad, Kq), x2d.dtype),
            jax.ShapeDtypeStruct((m_pad, Kkv), x2d.dtype),
            jax.ShapeDtypeStruct((m_pad, Kkv), x2d.dtype),
        ),
        grid=(m_pad // tm_eff,),
        in_specs=[
            pl.BlockSpec((tm_eff, K), lambda i: (i, 0)),
            pl.BlockSpec((1, K), lambda i: (0, 0)),
            pl.BlockSpec((K, Kq), lambda i: (0, 0)),
            pl.BlockSpec((K, Kkv), lambda i: (0, 0)),
            pl.BlockSpec((K, Kkv), lambda i: (0, 0)),
        ],
        out_specs=(
            pl.BlockSpec((tm_eff, Kq), lambda i: (i, 0)),
            pl.BlockSpec((tm_eff, Kkv), lambda i: (i, 0)),
            pl.BlockSpec((tm_eff, Kkv), lambda i: (i, 0)),
        ),
        compiler_params=pltpu.CompilerParams(dimension_semantics=("parallel",)),
    )(xp, lnw2, wq_t, wk_t, wv_t)
    return q[:M], k[:M], v[:M]


# ----------------------------------------------------------------------------
# 2. attention core (per batch*head): softmax((q k^T)*scale * mw + mb) @ v
# ----------------------------------------------------------------------------
def _attn_core_kernel(q_ref, k_ref, v_ref, mw_ref, mb_ref, o_ref, *, attn_scale):
    att = jnp.einsum("td,sd->ts", q_ref[...], k_ref[...],
                     preferred_element_type=jnp.float32)
    att = att * attn_scale
    att = att * mw_ref[...] + mb_ref[...]
    att = att - jnp.max(att, axis=-1, keepdims=True)
    p = jnp.exp(att)
    denom = jnp.sum(p, axis=-1, keepdims=True)
    p = (p * pl.reciprocal(denom, approx=True)).astype(v_ref.dtype)
    out = jnp.einsum("ts,sd->td", p, v_ref[...],
                     preferred_element_type=jnp.float32)
    o_ref[...] = out.astype(o_ref.dtype)


def attention_core(q_g, k_g, v_g, mw, mb, *, attn_scale):
    G, T, D = q_g.shape
    S = k_g.shape[1]
    return pl.pallas_call(
        functools.partial(_attn_core_kernel, attn_scale=attn_scale),
        out_shape=jax.ShapeDtypeStruct((G, T, D), q_g.dtype),
        grid=(G,),
        in_specs=[
            pl.BlockSpec((None, T, D), lambda g: (g, 0, 0)),
            pl.BlockSpec((None, S, D), lambda g: (g, 0, 0)),
            pl.BlockSpec((None, S, D), lambda g: (g, 0, 0)),
            pl.BlockSpec((T, S), lambda g: (0, 0)),   # resident across the grid
            pl.BlockSpec((T, S), lambda g: (0, 0)),
        ],
        out_specs=pl.BlockSpec((None, T, D), lambda g: (g, 0, 0)),
        compiler_params=pltpu.CompilerParams(dimension_semantics=("parallel",)),
    )(q_g, k_g, v_g, mw, mb)


# ----------------------------------------------------------------------------
# 3. o_proj * s + residual -> stm2, then post-attn RMSNorm (scale folded) -> h2
# ----------------------------------------------------------------------------
def _oproj_res_norm_kernel(a_ref, wo_ref, res_ref, lnw_ref,
                           stm2_ref, h2_ref, *, eps, out_scale):
    y = jnp.dot(a_ref[...], wo_ref[...], preferred_element_type=jnp.float32)
    stm2 = y * out_scale + res_ref[...].astype(jnp.float32)
    stm2_ref[...] = stm2.astype(stm2_ref.dtype)
    var = jnp.mean(stm2 * stm2, axis=-1, keepdims=True)
    h2 = stm2 * jax.lax.rsqrt(var + eps)
    h2 = h2 * lnw_ref[...].astype(jnp.float32) * out_scale
    h2_ref[...] = h2.astype(h2_ref.dtype)


def oproj_residual_norm(a2d, wo_t, res2d, ln_w, *, eps, out_scale, tm):
    M, K = a2d.shape
    Ko = wo_t.shape[1]
    tm_eff = min(tm, _round_up(M, 16))
    m_pad = _round_up(M, tm_eff)
    ap = _pad_rows(a2d, m_pad)
    rp = _pad_rows(res2d, m_pad)
    lnw2 = ln_w.reshape(1, Ko)
    stm2, h2 = pl.pallas_call(
        functools.partial(_oproj_res_norm_kernel, eps=eps, out_scale=out_scale),
        out_shape=(
            jax.ShapeDtypeStruct((m_pad, Ko), a2d.dtype),
            jax.ShapeDtypeStruct((m_pad, Ko), a2d.dtype),
        ),
        grid=(m_pad // tm_eff,),
        in_specs=[
            pl.BlockSpec((tm_eff, K), lambda i: (i, 0)),
            pl.BlockSpec((K, Ko), lambda i: (0, 0)),
            pl.BlockSpec((tm_eff, Ko), lambda i: (i, 0)),
            pl.BlockSpec((1, Ko), lambda i: (0, 0)),
        ],
        out_specs=(
            pl.BlockSpec((tm_eff, Ko), lambda i: (i, 0)),
            pl.BlockSpec((tm_eff, Ko), lambda i: (i, 0)),
        ),
        compiler_params=pltpu.CompilerParams(dimension_semantics=("parallel",)),
    )(ap, wo_t, rp, lnw2)
    return stm2[:M], h2[:M]


# ----------------------------------------------------------------------------
# 4. SwiGLU MLP, FFN-dim streamed + f32 accumulator + fused residual
# ----------------------------------------------------------------------------
def _mlp_kernel(x_ref, wg_ref, wu_ref, wd_ref, res_ref, o_ref, acc_ref,
                *, out_scale):
    f = pl.program_id(1)

    @pl.when(f == 0)
    def _():
        acc_ref[...] = jnp.zeros_like(acc_ref)

    x = x_ref[...]                                   # (tm, K), resident across f
    gate = jnp.dot(x, wg_ref[...], preferred_element_type=jnp.float32)
    up = jnp.dot(x, wu_ref[...], preferred_element_type=jnp.float32)
    # pre-activation inv_linear_scale already folded into x (norm epilogue)
    gate = gate * jax.lax.logistic(gate)             # SiLU (EUP + VPU)
    h = (gate * up).astype(x.dtype)
    acc_ref[...] += jnp.dot(h, wd_ref[...], preferred_element_type=jnp.float32)

    @pl.when(f == pl.num_programs(1) - 1)
    def _():
        y = acc_ref[...] * out_scale + res_ref[...].astype(jnp.float32)
        o_ref[...] = y.astype(o_ref.dtype)


def mistral_mlp(x2d, res2d, wg_t, wu_t, wd_t, *, out_scale, tm=256, tf=512):
    M, K = x2d.shape
    F = wg_t.shape[1]
    tm_eff = min(tm, _round_up(M, 16))
    m_pad = _round_up(M, tm_eff)
    tf_eff = tf if (tf <= F and F % tf == 0) else F
    xp = _pad_rows(x2d, m_pad)
    rp = _pad_rows(res2d, m_pad)

    cost = pl.CostEstimate(
        flops=6 * m_pad * K * F,
        transcendentals=m_pad * F,
        bytes_accessed=(3 * K * F + 3 * m_pad * K) * 2,
    )

    out = pl.pallas_call(
        functools.partial(_mlp_kernel, out_scale=out_scale),
        out_shape=jax.ShapeDtypeStruct((m_pad, K), x2d.dtype),
        grid=(m_pad // tm_eff, F // tf_eff),
        in_specs=[
            pl.BlockSpec((tm_eff, K), lambda i, f: (i, 0)),       # x rows
            pl.BlockSpec((K, tf_eff), lambda i, f: (0, f)),       # gate W^T tile
            pl.BlockSpec((K, tf_eff), lambda i, f: (0, f)),       # up   W^T tile
            pl.BlockSpec((tf_eff, K), lambda i, f: (f, 0)),       # down W^T tile
            pl.BlockSpec((tm_eff, K), lambda i, f: (i, 0)),       # residual rows
        ],
        out_specs=pl.BlockSpec((tm_eff, K), lambda i, f: (i, 0)),
        scratch_shapes=[pltpu.VMEM((tm_eff, K), jnp.float32)],
        compiler_params=pltpu.CompilerParams(
            dimension_semantics=("parallel", "arbitrary"),
            vmem_limit_bytes=48 * 1024 * 1024,
        ),
        cost_estimate=cost,
    )(xp, wg_t, wu_t, wd_t, rp)
    return out[:M]


# ----------------------------------------------------------------------------
# full layer forward
# ----------------------------------------------------------------------------
def _rope(x, cos, sin):
    half = x.shape[-1] // 2
    x2 = jnp.concatenate([-x[..., half:], x[..., :half]], axis=-1)
    return (x * cos + x2 * sin).astype(x.dtype)


@functools.partial(
    jax.jit,
    static_argnames=("seq_start", "eps", "q_group", "attn_scale",
                     "inv_linear_scale", "tm", "tf"))
def cached_mistral_layer(stm, ln1_w, ln2_w, wq_t, wk_t, wv_t, wo_t,
                         wg_t, wu_t, wd_t, cos, sin, mask_w, mask_b,
                         k_cache, v_cache, *, seq_start, eps, q_group,
                         attn_scale, inv_linear_scale, tm=256, tf=512):
    B, T, H, D = stm.shape
    M, K = B * T, H * D
    seq_end = seq_start + T
    num_kv = H // q_group
    s = 1.0 if inv_linear_scale is None else float(inv_linear_scale)

    x2d = stm.reshape(M, K)

    # pre-attention RMSNorm (inv_linear_scale folded) + fused q/k/v projection
    q2d, k2d, v2d = norm_qkv_proj(x2d, ln1_w, wq_t, wk_t, wv_t,
                                  eps=eps, out_scale=s, tm=tm)

    # TODO(synk): GQA repeat_interleave, rotary embedding and the KV-cache slice
    # update are thin layout/elementwise ops; kept as jnp glue around the
    # kernels (production would do the cache update with a Pallas scatter +
    # input_output_aliases to avoid copying the cache).
    if q_group > 1:
        k2d = jnp.repeat(k2d.reshape(M, num_kv, 1, D), q_group, axis=2).reshape(M, K)
        v2d = jnp.repeat(v2d.reshape(M, num_kv, 1, D), q_group, axis=2).reshape(M, K)
    q4 = q2d.reshape(B, T, H, D)
    k4 = k2d.reshape(B, T, H, D)
    v4 = v2d.reshape(B, T, H, D)

    cos_t = cos[:, seq_start:seq_end, :, :]
    sin_t = sin[:, seq_start:seq_end, :, :]
    q4 = _rope(q4, cos_t, sin_t)
    k4 = _rope(k4, cos_t, sin_t)

    k_cache = k_cache.at[:B, seq_start:seq_end].set(k4)
    v_cache = v_cache.at[:B, seq_start:seq_end].set(v4)

    # attention over cached keys/values
    q_g = q4.transpose(0, 2, 1, 3).reshape(B * H, T, D)
    k_g = k_cache[:B, :seq_end].transpose(0, 2, 1, 3).reshape(B * H, seq_end, D)
    v_g = v_cache[:B, :seq_end].transpose(0, 2, 1, 3).reshape(B * H, seq_end, D)
    mw = mask_w[0, 0, seq_start:seq_end, :seq_end]
    mb = mask_b[0, 0, seq_start:seq_end, :seq_end]
    o_g = attention_core(q_g, k_g, v_g, mw, mb, attn_scale=attn_scale)
    o2d = o_g.reshape(B, H, T, D).transpose(0, 2, 1, 3).reshape(M, K)

    # o_proj * s + residual, and post-attention RMSNorm (scale folded), fused
    stm2, h2 = oproj_residual_norm(o2d, wo_t, x2d, ln2_w,
                                   eps=eps, out_scale=s, tm=tm)

    # SwiGLU MLP + residual (fused)
    out2d = mistral_mlp(h2, stm2, wg_t, wu_t, wd_t, out_scale=s, tm=tm, tf=tf)

    return out2d.reshape(B, T, H, D), k_cache, v_cache


# ----------------------------------------------------------------------------
# pure-JAX f32 reference (mirrors the torch forward op-by-op)
# ----------------------------------------------------------------------------
def _reference_layer(stm, ln1_w, ln2_w, wq_t, wk_t, wv_t, wo_t,
                     wg_t, wu_t, wd_t, cos, sin, mask_w, mask_b,
                     k_cache, v_cache, *, seq_start, eps, q_group,
                     attn_scale, inv_linear_scale):
    f32 = jnp.float32
    B, T, H, D = stm.shape
    M, K = B * T, H * D
    seq_end = seq_start + T
    num_kv = H // q_group
    s = 1.0 if inv_linear_scale is None else float(inv_linear_scale)

    def rms(x, w):
        v = jnp.mean(x * x, axis=1, keepdims=True)
        return x * jax.lax.rsqrt(v + eps) * w.astype(f32)[None, :]

    def rope(x, c, sn):
        half = D // 2
        x2 = jnp.concatenate([-x[..., half:], x[..., :half]], axis=-1)
        return x * c + x2 * sn

    x2d = stm.astype(f32).reshape(M, K)

    h1 = rms(x2d, ln1_w)
    q = h1 @ wq_t.astype(f32) * s
    k = h1 @ wk_t.astype(f32) * s
    v = h1 @ wv_t.astype(f32) * s
    if q_group > 1:
        k = jnp.repeat(k.reshape(M, num_kv, 1, D), q_group, axis=2).reshape(M, K)
        v = jnp.repeat(v.reshape(M, num_kv, 1, D), q_group, axis=2).reshape(M, K)
    q = q.reshape(B, T, H, D)
    k = k.reshape(B, T, H, D)
    v = v.reshape(B, T, H, D)
    c = cos[:, seq_start:seq_end].astype(f32)
    sn = sin[:, seq_start:seq_end].astype(f32)
    q = rope(q, c, sn)
    k = rope(k, c, sn)

    kc = k_cache.astype(f32).at[:B, seq_start:seq_end].set(k)
    vc = v_cache.astype(f32).at[:B, seq_start:seq_end].set(v)

    qh = q.transpose(0, 2, 1, 3)
    kh = kc[:B, :seq_end].transpose(0, 2, 1, 3)
    vh = vc[:B, :seq_end].transpose(0, 2, 1, 3)
    att = jnp.einsum("bhtd,bhsd->bhts", qh, kh) * attn_scale
    att = att * mask_w[:, :, seq_start:seq_end, :seq_end] \
        + mask_b[:, :, seq_start:seq_end, :seq_end]
    att = jax.nn.softmax(att, axis=-1)
    o = jnp.einsum("bhts,bhsd->bhtd", att, vh)
    o = o.transpose(0, 2, 1, 3).reshape(M, K)
    o = o @ wo_t.astype(f32) * s
    stm2 = x2d + o

    h2 = rms(stm2, ln2_w)
    gate = h2 @ wg_t.astype(f32) * s
    up = h2 @ wu_t.astype(f32) * s
    gate = gate * jax.nn.sigmoid(gate)
    down = (gate * up) @ wd_t.astype(f32) * s
    out = (stm2 + down).reshape(B, T, H, D)
    return out, kc, vc


# ----------------------------------------------------------------------------
# main
# ----------------------------------------------------------------------------
if __name__ == "__main__":
    B, T = 2, 8
    num_head, head_dim, q_group = 4, 8, 2
    inner_dim = num_head * head_dim                      # 32
    kv_inner_dim = (num_head // q_group) * head_dim      # 16
    mlp_inner_dim = 64
    max_batch_size, max_seq_len = 2, 16
    seq_start = 0
    eps = 1e-6
    dtype = jnp.bfloat16

    key = jax.random.PRNGKey(0)
    ks = jax.random.split(key, 10)

    stm = jax.random.normal(ks[0], (B, T, num_head, head_dim), jnp.float32).astype(dtype)

    def linear_w(k, out_f, in_f):
        # torch.nn.Linear stores (out_features, in_features); pre-transpose so
        # y = x @ W_t matches torch's y = x @ W.T
        return (0.05 * jax.random.normal(k, (out_f, in_f), jnp.float32)).astype(dtype).T

    wq_t = linear_w(ks[1], inner_dim, inner_dim)
    wk_t = linear_w(ks[2], kv_inner_dim, inner_dim)
    wv_t = linear_w(ks[3], kv_inner_dim, inner_dim)
    wo_t = linear_w(ks[4], inner_dim, inner_dim)
    wg_t = linear_w(ks[5], mlp_inner_dim, inner_dim)
    wu_t = linear_w(ks[6], mlp_inner_dim, inner_dim)
    wd_t = linear_w(ks[7], inner_dim, mlp_inner_dim)

    ln1_w = (1.0 + 0.1 * jax.random.normal(ks[8], (inner_dim,), jnp.float32)).astype(dtype)
    ln2_w = (1.0 + 0.1 * jax.random.normal(ks[9], (inner_dim,), jnp.float32)).astype(dtype)

    # "consts"-registered tables: rotary cos/sin, causal mask_w/mask_b, scales
    half = head_dim // 2
    inv_freq = 1.0 / (10000.0 ** (jnp.arange(half, dtype=jnp.float32) / half))
    pos = jnp.arange(max_seq_len, dtype=jnp.float32)
    ang = pos[:, None] * inv_freq[None, :]
    cos = jnp.concatenate([jnp.cos(ang), jnp.cos(ang)], axis=-1)[None, :, None, :].astype(dtype)
    sin = jnp.concatenate([jnp.sin(ang), jnp.sin(ang)], axis=-1)[None, :, None, :].astype(dtype)

    ii = jnp.arange(max_seq_len)[:, None]
    jj = jnp.arange(max_seq_len)[None, :]
    causal = jj <= ii
    mask_w = causal.astype(jnp.float32)[None, None]
    mask_b = jnp.where(causal, 0.0, -1e9).astype(jnp.float32)[None, None]

    attn_scale = 1.0 / math.sqrt(head_dim)
    inv_linear_scale = 0.5    # consts._register_linear; pass None -> 1.0

    k_cache = jnp.zeros((max_batch_size, max_seq_len, num_head, head_dim), dtype)
    v_cache = jnp.zeros((max_batch_size, max_seq_len, num_head, head_dim), dtype)

    out, k_new, v_new = cached_mistral_layer(
        stm, ln1_w, ln2_w, wq_t, wk_t, wv_t, wo_t, wg_t, wu_t, wd_t,
        cos, sin, mask_w, mask_b, k_cache, v_cache,
        seq_start=seq_start, eps=eps, q_group=q_group,
        attn_scale=attn_scale, inv_linear_scale=inv_linear_scale,
        tm=256, tf=512)
    out, k_new, v_new = jax.block_until_ready((out, k_new, v_new))

    ref_out, ref_kc, ref_vc = _reference_layer(
        stm, ln1_w, ln2_w, wq_t, wk_t, wv_t, wo_t, wg_t, wu_t, wd_t,
        cos, sin, mask_w, mask_b, k_cache, v_cache,
        seq_start=seq_start, eps=eps, q_group=q_group,
        attn_scale=attn_scale, inv_linear_scale=inv_linear_scale)

    assert out.shape == stm.shape and out.dtype == dtype
    assert jnp.allclose(out.astype(jnp.float32), ref_out, atol=5e-2, rtol=5e-2)
    assert jnp.allclose(k_new.astype(jnp.float32), ref_kc, atol=2e-2, rtol=2e-2)
    assert jnp.allclose(v_new.astype(jnp.float32), ref_vc, atol=2e-2, rtol=2e-2)

    print("KERNEL_OK")
</pallas_src>

<mosaic_0001>
module attributes {stable_mosaic.version = 11 : i64} {
  func.func @_norm_qkv_kernel(%arg0: i32, %arg1: memref<16x32xbf16, #tpu.memory_space<vmem>>, %arg2: memref<1x32xbf16, #tpu.memory_space<vmem>>, %arg3: memref<32x32xbf16, #tpu.memory_space<vmem>>, %arg4: memref<32x16xbf16, #tpu.memory_space<vmem>>, %arg5: memref<32x16xbf16, #tpu.memory_space<vmem>>, %arg6: memref<16x32xbf16, #tpu.memory_space<vmem>>, %arg7: memref<16x16xbf16, #tpu.memory_space<vmem>>, %arg8: memref<16x16xbf16, #tpu.memory_space<vmem>>) attributes {dimension_semantics = [#tpu.dimension_semantics<parallel>], iteration_bounds = array<i64: 1>, scalar_prefetch = 0 : i64, scratch_operands = 0 : i64, tpu.core_type = #tpu.core_type<tc>, window_params = [{transform_indices = @transform_0, window_bounds = array<i64: 16, 32>}, {pipeline_mode = #tpu.pipeline_mode<synchronous>, transform_indices = @transform_1, window_bounds = array<i64: 1, 32>}, {pipeline_mode = #tpu.pipeline_mode<synchronous>, transform_indices = @transform_2, window_bounds = array<i64: 32, 32>}, {pipeline_mode = #tpu.pipeline_mode<synchronous>, transform_indices = @transform_3, window_bounds = array<i64: 32, 16>}, {pipeline_mode = #tpu.pipeline_mode<synchronous>, transform_indices = @transform_4, window_bounds = array<i64: 32, 16>}, {transform_indices = @transform_5, window_bounds = array<i64: 16, 32>}, {transform_indices = @transform_6, window_bounds = array<i64: 16, 16>}, {transform_indices = @transform_7, window_bounds = array<i64: 16, 16>}]} {
    %c0 = arith.constant 0 : index
    %c0_0 = arith.constant 0 : index
    %0 = vector.load %arg1[%c0, %c0_0] : memref<16x32xbf16, #tpu.memory_space<vmem>>, vector<16x32xbf16>
    %1 = arith.extf %0 : vector<16x32xbf16> to vector<16x32xf32>
    %2 = arith.mulf %1, %1 : vector<16x32xf32>
    %cst = arith.constant dense<0.000000e+00> : vector<16xf32>
    %3 = vector.multi_reduction <add>, %2, %cst [1] : vector<16x32xf32> to vector<16xf32>
    %4 = vector.shape_cast %3 : vector<16xf32> to vector<16x1xf32>
    %cst_1 = arith.constant 3.200000e+01 : f32
    %5 = vector.broadcast %cst_1 : f32 to vector<16x1xf32>
    %6 = arith.divf %4, %5 : vector<16x1xf32>
    %cst_2 = arith.constant 9.99999997E-7 : f32
    %7 = vector.broadcast %cst_2 : f32 to vector<16x1xf32>
    %8 = arith.addf %6, %7 : vector<16x1xf32>
    %9 = math.rsqrt %8 : vector<16x1xf32>
    %10 = vector.broadcast %9 : vector<16x1xf32> to vector<16x32xf32>
    %11 = arith.mulf %1, %10 : vector<16x32xf32>
    %c0_3 = arith.constant 0 : index
    %c0_4 = arith.constant 0 : index
    %12 = vector.load %arg2[%c0_3, %c0_4] : memref<1x32xbf16, #tpu.memory_space<vmem>>, vector<1x32xbf16>
    %13 = arith.extf %12 : vector<1x32xbf16> to vector<1x32xf32>
    %14 = vector.broadcast %13 : vector<1x32xf32> to vector<16x32xf32>
    %15 = arith.mulf %11, %14 : vector<16x32xf32>
    %cst_5 = arith.constant 5.000000e-01 : f32
    %16 = vector.broadcast %cst_5 : f32 to vector<16x32xf32>
    %17 = arith.mulf %15, %16 : vector<16x32xf32>
    %18 = arith.truncf %17 : vector<16x32xf32> to vector<16x32xbf16>
    %c0_6 = arith.constant 0 : index
    %c0_7 = arith.constant 0 : index
    %19 = vector.load %arg3[%c0_6, %c0_7] : memref<32x32xbf16, #tpu.memory_space<vmem>>, vector<32x32xbf16>
    %cst_8 = arith.constant dense<0.000000e+00> : vector<16x32xf32>
    %20 = tpu.matmul %18, %19, %cst_8 {dimension_numbers = #tpu.dot_dimension_numbers<[1], [0], [0], [1], [0, 0, 1, 1], [], []>} : vector<16x32xbf16>, vector<32x32xbf16>, vector<16x32xf32> -> vector<16x32xf32>
    %21 = arith.truncf %20 : vector<16x32xf32> to vector<16x32xbf16>
    %c0_9 = arith.constant 0 : index
    %c0_10 = arith.constant 0 : index
    %22 = vector.load %arg6[%c0_9, %c0_10] : memref<16x32xbf16, #tpu.memory_space<vmem>>, vector<16x32xbf16>
    tpu.vector_store %arg6[%c0_9, %c0_10], %21 {strides = array<i32>} : memref<16x32xbf16, #tpu.memory_space<vmem>>, vector<16x32xbf16>,
    %c0_11 = arith.constant 0 : index
    %c0_12 = arith.constant 0 : index
    %23 = vector.load %arg4[%c0_11, %c0_12] : memref<32x16xbf16, #tpu.memory_space<vmem>>, vector<32x16xbf16>
    %cst_13 = arith.constant dense<0.000000e+00> : vector<16x16xf32>
    %24 = tpu.matmul %18, %23, %cst_13 {dimension_numbers = #tpu.dot_dimension_numbers<[1], [0], [0], [1], [0, 0, 1, 1], [], []>} : vector<16x32xbf16>, vector<32x16xbf16>, vector<16x16xf32> -> vector<16x16xf32>
    %25 = arith.truncf %24 : vector<16x16xf32> to vector<16x16xbf16>
    %c0_14 = arith.constant 0 : index
    %c0_15 = arith.constant 0 : index
    %26 = vector.load %arg7[%c0_14, %c0_15] : memref<16x16xbf16, #tpu.memory_space<vmem>>, vector<16x16xbf16>
    tpu.vector_store %arg7[%c0_14, %c0_15], %25 {strides = array<i32>} : memref<16x16xbf16, #tpu.memory_space<vmem>>, vector<16x16xbf16>,
    %c0_16 = arith.constant 0 : index
    %c0_17 = arith.constant 0 : index
    %27 = vector.load %arg5[%c0_16, %c0_17] : memref<32x16xbf16, #tpu.memory_space<vmem>>, vector<32x16xbf16>
    %cst_18 = arith.constant dense<0.000000e+00> : vector<16x16xf32>
    %28 = tpu.matmul %18, %27, %cst_18 {dimension_numbers = #tpu.dot_dimension_numbers<[1], [0], [0], [1], [0, 0, 1, 1], [], []>} : vector<16x32xbf16>, vector<32x16xbf16>, vector<16x16xf32> -> vector<16x16xf32>
    %29 = arith.truncf %28 : vector<16x16xf32> to vector<16x16xbf16>
    %c0_19 = arith.constant 0 : index
    %c0_20 = arith.constant 0 : index
    %30 = vector.load %arg8[%c0_19, %c0_20] : memref<16x16xbf16, #tpu.memory_space<vmem>>, vector<16x16xbf16>
    tpu.vector_store %arg8[%c0_19, %c0_20], %29 {strides = array<i32>} : memref<16x16xbf16, #tpu.memory_space<vmem>>, vector<16x16xbf16>,
    return
  }
  func.func @transform_0(%arg0: i32) -> (i32, i32) {
    %c0_i32 = arith.constant 0 : i32
    %c0_i32_0 = arith.constant 0 : i32
    return %arg0, %c0_i32 : i32, i32
  }
  func.func @transform_1(%arg0: i32) -> (i32, i32) {
    %c0_i32 = arith.constant 0 : i32
    %c0_i32_0 = arith.constant 0 : i32
    %c0_i32_1 = arith.constant 0 : i32
    return %c0_i32, %c0_i32_0 : i32, i32
  }
  func.func @transform_2(%arg0: i32) -> (i32, i32) {
    %c0_i32 = arith.constant 0 : i32
    %c0_i32_0 = arith.constant 0 : i32
    %c0_i32_1 = arith.constant 0 : i32
    return %c0_i32, %c0_i32_0 : i32, i32
  }
  func.func @transform_3(%arg0: i32) -> (i32, i32) {
    %c0_i32 = arith.constant 0 : i32
    %c0_i32_0 = arith.constant 0 : i32
    %c0_i32_1 = arith.constant 0 : i32
    return %c0_i32, %c0_i32_0 : i32, i32
  }
  func.func @transform_4(%arg0: i32) -> (i32, i32) {
    %c0_i32 = arith.constant 0 : i32
    %c0_i32_0 = arith.constant 0 : i32
    %c0_i32_1 = arith.constant 0 : i32
    return %c0_i32, %c0_i32_0 : i32, i32
  }
  func.func @transform_5(%arg0: i32) -> (i32, i32) {
    %c0_i32 = arith.constant 0 : i32
    %c0_i32_0 = arith.constant 0 : i32
    return %arg0, %c0_i32 : i32, i32
  }
  func.func @transform_6(%arg0: i32) -> (i32, i32) {
    %c0_i32 = arith.constant 0 : i32
    %c0_i32_0 = arith.constant 0 : i32
    return %arg0, %c0_i32 : i32, i32
  }
  func.func @transform_7(%arg0: i32) -> (i32, i32) {
    %c0_i32 = arith.constant 0 : i32
    %c0_i32_0 = arith.constant 0 : i32
    return %arg0, %c0_i32 : i32, i32
  }
}

module attributes {stable_mosaic.version = 11 : i64} {
  func.func @_attn_core_kernel(%arg0: i32, %arg1: memref<1x8x8xbf16, #tpu.memory_space<vmem>>, %arg2: memref<1x8x8xbf16, #tpu.memory_space<vmem>>, %arg3: memref<1x8x8xbf16, #tpu.memory_space<vmem>>, %arg4: memref<8x8xf32, #tpu.memory_space<vmem>>, %arg5: memref<8x8xf32, #tpu.memory_space<vmem>>, %arg6: memref<1x8x8xbf16, #tpu.memory_space<vmem>>) attributes {dimension_semantics = [#tpu.dimension_semantics<parallel>], iteration_bounds = array<i64: 8>, scalar_prefetch = 0 : i64, scratch_operands = 0 : i64, tpu.core_type = #tpu.core_type<tc>, window_params = [{transform_indices = @transform_0, window_bounds = array<i64: 1, 8, 8>}, {transform_indices = @transform_1, window_bounds = array<i64: 1, 8, 8>}, {transform_indices = @transform_2, window_bounds = array<i64: 1, 8, 8>}, {pipeline_mode = #tpu.pipeline_mode<synchronous>, transform_indices = @transform_3, window_bounds = array<i64: 8, 8>}, {pipeline_mode = #tpu.pipeline_mode<synchronous>, transform_indices = @transform_4, window_bounds = array<i64: 8, 8>}, {transform_indices = @transform_5, window_bounds = array<i64: 1, 8, 8>}]} {
    %c0 = arith.constant 0 : index
    %c0_0 = arith.constant 0 : index
    %c0_1 = arith.constant 0 : index
    %0 = vector.load %arg1[%c0, %c0_0, %c0_1] : memref<1x8x8xbf16, #tpu.memory_space<vmem>>, vector<1x8x8xbf16>
    %1 = vector.shape_cast %0 : vector<1x8x8xbf16> to vector<8x8xbf16>
    %c0_2 = arith.constant 0 : index
    %c0_3 = arith.constant 0 : index
    %c0_4 = arith.constant 0 : index
    %2 = vector.load %arg2[%c0_2, %c0_3, %c0_4] : memref<1x8x8xbf16, #tpu.memory_space<vmem>>, vector<1x8x8xbf16>
    %3 = vector.shape_cast %2 : vector<1x8x8xbf16> to vector<8x8xbf16>
    "tpu.trace_start"() <{level = 10 : i32, message = "td,sd->ts"}> : () -> ()
    %cst = arith.constant dense<0.000000e+00> : vector<8x8xf32>
    %4 = tpu.matmul %1, %3, %cst {dimension_numbers = #tpu.dot_dimension_numbers<[1], [1], [0], [0], [0, 0, 1, 0], [], []>} : vector<8x8xbf16>, vector<8x8xbf16>, vector<8x8xf32> -> vector<8x8xf32>
    "tpu.trace_stop"() : () -> ()
    %cst_5 = arith.constant 0.353553385 : f32
    %5 = vector.broadcast %cst_5 : f32 to vector<8x8xf32>
    %6 = arith.mulf %4, %5 : vector<8x8xf32>
    %c0_6 = arith.constant 0 : index
    %c0_7 = arith.constant 0 : index
    %7 = vector.load %arg4[%c0_6, %c0_7] : memref<8x8xf32, #tpu.memory_space<vmem>>, vector<8x8xf32>
    %8 = arith.mulf %6, %7 : vector<8x8xf32>
    %c0_8 = arith.constant 0 : index
    %c0_9 = arith.constant 0 : index
    %9 = vector.load %arg5[%c0_8, %c0_9] : memref<8x8xf32, #tpu.memory_space<vmem>>, vector<8x8xf32>
    %10 = arith.addf %8, %9 : vector<8x8xf32>
    %cst_10 = arith.constant dense<0xFF800000> : vector<8xf32>
    %11 = vector.multi_reduction <maximumf>, %10, %cst_10 [1] : vector<8x8xf32> to vector<8xf32>
    %12 = vector.shape_cast %11 : vector<8xf32> to vector<8x1xf32>
    %13 = vector.broadcast %12 : vector<8x1xf32> to vector<8x8xf32>
    %14 = arith.subf %10, %13 : vector<8x8xf32>
    %15 = math.exp %14 : vector<8x8xf32>
    %cst_11 = arith.constant dense<0.000000e+00> : vector<8xf32>
    %16 = vector.multi_reduction <add>, %15, %cst_11 [1] : vector<8x8xf32> to vector<8xf32>
    %17 = vector.shape_cast %16 : vector<8xf32> to vector<8x1xf32>
    %18 = tpu.reciprocal %17 {approx = true} : vector<8x1xf32> -> vector<8x1xf32>
    %19 = vector.broadcast %18 : vector<8x1xf32> to vector<8x8xf32>
    %20 = arith.mulf %15, %19 : vector<8x8xf32>
    %21 = arith.truncf %20 : vector<8x8xf32> to vector<8x8xbf16>
    %c0_12 = arith.constant 0 : index
    %c0_13 = arith.constant 0 : index
    %c0_14 = arith.constant 0 : index
    %22 = vector.load %arg3[%c0_12, %c0_13, %c0_14] : memref<1x8x8xbf16, #tpu.memory_space<vmem>>, vector<1x8x8xbf16>
    %23 = vector.shape_cast %22 : vector<1x8x8xbf16> to vector<8x8xbf16>
    "tpu.trace_start"() <{level = 10 : i32, message = "ts,sd->td"}> : () -> ()
    %cst_15 = arith.constant dense<0.000000e+00> : vector<8x8xf32>
    %24 = tpu.matmul %21, %23, %cst_15 {dimension_numbers = #tpu.dot_dimension_numbers<[1], [0], [0], [1], [0, 0, 1, 1], [], []>} : vector<8x8xbf16>, vector<8x8xbf16>, vector<8x8xf32> -> vector<8x8xf32>
    "tpu.trace_stop"() : () -> ()
    %25 = arith.truncf %24 : vector<8x8xf32> to vector<8x8xbf16>
    %c0_16 = arith.constant 0 : index
    %c0_17 = arith.constant 0 : index
    %c0_18 = arith.constant 0 : index
    %26 = vector.load %arg6[%c0_16, %c0_17, %c0_18] : memref<1x8x8xbf16, #tpu.memory_space<vmem>>, vector<1x8x8xbf16>
    %27 = vector.shape_cast %26 : vector<1x8x8xbf16> to vector<8x8xbf16>
    %28 = vector.shape_cast %25 : vector<8x8xbf16> to vector<1x8x8xbf16>
    tpu.vector_store %arg6[%c0_16, %c0_17, %c0_18], %28 {strides = array<i32>} : memref<1x8x8xbf16, #tpu.memory_space<vmem>>, vector<1x8x8xbf16>,
    return
  }
  func.func @transform_0(%arg0: i32) -> (i32, i32, i32) {
    %c0_i32 = arith.constant 0 : i32
    %c0_i32_0 = arith.constant 0 : i32
    %c0_i32_1 = arith.constant 0 : i32
    return %arg0, %c0_i32, %c0_i32_0 : i32, i32, i32
  }
  func.func @transform_1(%arg0: i32) -> (i32, i32, i32) {
    %c0_i32 = arith.constant 0 : i32
    %c0_i32_0 = arith.constant 0 : i32
    %c0_i32_1 = arith.constant 0 : i32
    return %arg0, %c0_i32, %c0_i32_0 : i32, i32, i32
  }
  func.func @transform_2(%arg0: i32) -> (i32, i32, i32) {
    %c0_i32 = arith.constant 0 : i32
    %c0_i32_0 = arith.constant 0 : i32
    %c0_i32_1 = arith.constant 0 : i32
    return %arg0, %c0_i32, %c0_i32_0 : i32, i32, i32
  }
  func.func @transform_3(%arg0: i32) -> (i32, i32) {
    %c0_i32 = arith.constant 0 : i32
    %c0_i32_0 = arith.constant 0 : i32
    %c0_i32_1 = arith.constant 0 : i32
    return %c0_i32, %c0_i32_0 : i32, i32
  }
  func.func @transform_4(%arg0: i32) -> (i32, i32) {
    %c0_i32 = arith.constant 0 : i32
    %c0_i32_0 = arith.constant 0 : i32
    %c0_i32_1 = arith.constant 0 : i32
    return %c0_i32, %c0_i32_0 : i32, i32
  }
  func.func @transform_5(%arg0: i32) -> (i32, i32, i32) {
    %c0_i32 = arith.constant 0 : i32
    %c0_i32_0 = arith.constant 0 : i32
    %c0_i32_1 = arith.constant 0 : i32
    return %arg0, %c0_i32, %c0_i32_0 : i32, i32, i32
  }
}

module attributes {stable_mosaic.version = 11 : i64} {
  func.func @_mlp_kernel(%arg0: i32, %arg1: i32, %arg2: memref<16x32xbf16, #tpu.memory_space<vmem>>, %arg3: memref<32x64xbf16, #tpu.memory_space<vmem>>, %arg4: memref<32x64xbf16, #tpu.memory_space<vmem>>, %arg5: memref<64x32xbf16, #tpu.memory_space<vmem>>, %arg6: memref<16x32xbf16, #tpu.memory_space<vmem>>, %arg7: memref<16x32xbf16, #tpu.memory_space<vmem>>, %arg8: memref<16x32xf32, #tpu.memory_space<vmem>>) attributes {dimension_semantics = [#tpu.dimension_semantics<parallel>, #tpu.dimension_semantics<arbitrary>], iteration_bounds = array<i64: 1, 1>, scalar_prefetch = 0 : i64, scratch_operands = 1 : i64, tpu.core_type = #tpu.core_type<tc>, window_params = [{transform_indices = @transform_0, window_bounds = array<i64: 16, 32>}, {transform_indices = @transform_1, window_bounds = array<i64: 32, 64>}, {transform_indices = @transform_2, window_bounds = array<i64: 32, 64>}, {transform_indices = @transform_3, window_bounds = array<i64: 64, 32>}, {transform_indices = @transform_4, window_bounds = array<i64: 16, 32>}, {transform_indices = @transform_5, window_bounds = array<i64: 16, 32>}]} {
    %c0_i32 = arith.constant 0 : i32
    %0 = arith.cmpi eq, %arg1, %c0_i32 : i32
    %1 = arith.extui %0 : i1 to i32
    %c0_i32_0 = arith.constant 0 : i32
    %2 = arith.cmpi ne, %1, %c0_i32_0 : i32
    scf.if %2 {
      %cst_17 = arith.constant 0.000000e+00 : f32
      %24 = vector.broadcast %cst_17 : f32 to vector<16x32xf32>
      %c0_18 = arith.constant 0 : index
      %c0_19 = arith.constant 0 : index
      %25 = vector.load %arg8[%c0_18, %c0_19] : memref<16x32xf32, #tpu.memory_space<vmem>>, vector<16x32xf32>
      tpu.vector_store %arg8[%c0_18, %c0_19], %24 {strides = array<i32>} : memref<16x32xf32, #tpu.memory_space<vmem>>, vector<16x32xf32>,
    } else {
    }
    %c0 = arith.constant 0 : index
    %c0_1 = arith.constant 0 : index
    %3 = vector.load %arg2[%c0, %c0_1] : memref<16x32xbf16, #tpu.memory_space<vmem>>, vector<16x32xbf16>
    %c0_2 = arith.constant 0 : index
    %c0_3 = arith.constant 0 : index
    %4 = vector.load %arg3[%c0_2, %c0_3] : memref<32x64xbf16, #tpu.memory_space<vmem>>, vector<32x64xbf16>
    %cst = arith.constant dense<0.000000e+00> : vector<16x64xf32>
    %5 = tpu.matmul %3, %4, %cst {dimension_numbers = #tpu.dot_dimension_numbers<[1], [0], [0], [1], [0, 0, 1, 1], [], []>} : vector<16x32xbf16>, vector<32x64xbf16>, vector<16x64xf32> -> vector<16x64xf32>
    %c0_4 = arith.constant 0 : index
    %c0_5 = arith.constant 0 : index
    %6 = vector.load %arg4[%c0_4, %c0_5] : memref<32x64xbf16, #tpu.memory_space<vmem>>, vector<32x64xbf16>
    %cst_6 = arith.constant dense<0.000000e+00> : vector<16x64xf32>
    %7 = tpu.matmul %3, %6, %cst_6 {dimension_numbers = #tpu.dot_dimension_numbers<[1], [0], [0], [1], [0, 0, 1, 1], [], []>} : vector<16x32xbf16>, vector<32x64xbf16>, vector<16x64xf32> -> vector<16x64xf32>
    %8 = arith.negf %5 : vector<16x64xf32>
    %9 = math.exp %8 : vector<16x64xf32>
    %cst_7 = arith.constant 1.000000e+00 : f32
    %10 = vector.broadcast %cst_7 : f32 to vector<16x64xf32>
    %11 = arith.addf %10, %9 : vector<16x64xf32>
    %12 = arith.divf %10, %11 : vector<16x64xf32>
    %13 = arith.mulf %5, %12 : vector<16x64xf32>
    %14 = arith.mulf %13, %7 : vector<16x64xf32>
    %15 = arith.truncf %14 : vector<16x64xf32> to vector<16x64xbf16>
    %c0_8 = arith.constant 0 : index
    %c0_9 = arith.constant 0 : index
    %16 = vector.load %arg8[%c0_8, %c0_9] : memref<16x32xf32, #tpu.memory_space<vmem>>, vector<16x32xf32>
    %c0_10 = arith.constant 0 : index
    %c0_11 = arith.constant 0 : index
    %17 = vector.load %arg5[%c0_10, %c0_11] : memref<64x32xbf16, #tpu.memory_space<vmem>>, vector<64x32xbf16>
    %cst_12 = arith.constant dense<0.000000e+00> : vector<16x32xf32>
    %18 = tpu.matmul %15, %17, %cst_12 {dimension_numbers = #tpu.dot_dimension_numbers<[1], [0], [0], [1], [0, 0, 1, 1], [], []>} : vector<16x64xbf16>, vector<64x32xbf16>, vector<16x32xf32> -> vector<16x32xf32>
    %19 = arith.addf %16, %18 : vector<16x32xf32>
    %c0_13 = arith.constant 0 : index
    %c0_14 = arith.constant 0 : index
    %20 = vector.load %arg8[%c0_13, %c0_14] : memref<16x32xf32, #tpu.memory_space<vmem>>, vector<16x32xf32>
    tpu.vector_store %arg8[%c0_13, %c0_14], %19 {strides = array<i32>} : memref<16x32xf32, #tpu.memory_space<vmem>>, vector<16x32xf32>,
    %c0_i32_15 = arith.constant 0 : i32
    %21 = arith.cmpi eq, %arg1, %c0_i32_15 : i32
    %22 = arith.extui %21 : i1 to i32
    %c0_i32_16 = arith.constant 0 : i32
    %23 = arith.cmpi ne, %22, %c0_i32_16 : i32
    scf.if %23 {
      %c0_17 = arith.constant 0 : index
      %c0_18 = arith.constant 0 : index
      %24 = vector.load %arg8[%c0_17, %c0_18] : memref<16x32xf32, #tpu.memory_space<vmem>>, vector<16x32xf32>
      %cst_19 = arith.constant 5.000000e-01 : f32
      %25 = vector.broadcast %cst_19 : f32 to vector<16x32xf32>
      %26 = arith.mulf %24, %25 : vector<16x32xf32>
      %c0_20 = arith.constant 0 : index
      %c0_21 = arith.constant 0 : index
      %27 = vector.load %arg6[%c0_20, %c0_21] : memref<16x32xbf16, #tpu.memory_space<vmem>>, vector<16x32xbf16>
      %28 = arith.extf %27 : vector<16x32xbf16> to vector<16x32xf32>
      %29 = arith.addf %26, %28 : vector<16x32xf32>
      %30 = arith.truncf %29 : vector<16x32xf32> to vector<16x32xbf16>
      %c0_22 = arith.constant 0 : index
      %c0_23 = arith.constant 0 : index
      %31 = vector.load %arg7[%c0_22, %c0_23] : memref<16x32xbf16, #tpu.memory_space<vmem>>, vector<16x32xbf16>
      tpu.vector_store %arg7[%c0_22, %c0_23], %30 {strides = array<i32>} : memref<16x32xbf16, #tpu.memory_space<vmem>>, vector<16x32xbf16>,
    } else {
    }
    return
  }
  func.func @transform_0(%arg0: i32, %arg1: i32) -> (i32, i32) {
    %c0_i32 = arith.constant 0 : i32
    %c0_i32_0 = arith.constant 0 : i32
    return %arg0, %c0_i32 : i32, i32
  }
  func.func @transform_1(%arg0: i32, %arg1: i32) -> (i32, i32) {
    %c0_i32 = arith.constant 0 : i32
    %c0_i32_0 = arith.constant 0 : i32
    return %c0_i32, %arg1 : i32, i32
  }
  func.func @transform_2(%arg0: i32, %arg1: i32) -> (i32, i32) {
    %c0_i32 = arith.constant 0 : i32
    %c0_i32_0 = arith.constant 0 : i32
    return %c0_i32, %arg1 : i32, i32
  }
  func.func @transform_3(%arg0: i32, %arg1: i32) -> (i32, i32) {
    %c0_i32 = arith.constant 0 : i32
    %c0_i32_0 = arith.constant 0 : i32
    return %arg1, %c0_i32 : i32, i32
  }
  func.func @transform_4(%arg0: i32, %arg1: i32) -> (i32, i32) {
    %c0_i32 = arith.constant 0 : i32
    %c0_i32_0 = arith.constant 0 : i32
    return %arg0, %c0_i32 : i32, i32
  }
  func.func @transform_5(%arg0: i32, %arg1: i32) -> (i32, i32) {
    %c0_i32 = arith.constant 0 : i32
    %c0_i32_0 = arith.constant 0 : i32
    return %arg0, %c0_i32 : i32, i32
  }
}

module attributes {stable_mosaic.version = 11 : i64} {
  func.func @_oproj_res_norm_kernel(%arg0: i32, %arg1: memref<16x32xbf16, #tpu.memory_space<vmem>>, %arg2: memref<32x32xbf16, #tpu.memory_space<vmem>>, %arg3: memref<16x32xbf16, #tpu.memory_space<vmem>>, %arg4: memref<1x32xbf16, #tpu.memory_space<vmem>>, %arg5: memref<16x32xbf16, #tpu.memory_space<vmem>>, %arg6: memref<16x32xbf16, #tpu.memory_space<vmem>>) attributes {dimension_semantics = [#tpu.dimension_semantics<parallel>], iteration_bounds = array<i64: 1>, scalar_prefetch = 0 : i64, scratch_operands = 0 : i64, tpu.core_type = #tpu.core_type<tc>, window_params = [{transform_indices = @transform_0, window_bounds = array<i64: 16, 32>}, {pipeline_mode = #tpu.pipeline_mode<synchronous>, transform_indices = @transform_1, window_bounds = array<i64: 32, 32>}, {transform_indices = @transform_2, window_bounds = array<i64: 16, 32>}, {pipeline_mode = #tpu.pipeline_mode<synchronous>, transform_indices = @transform_3, window_bounds = array<i64: 1, 32>}, {transform_indices = @transform_4, window_bounds = array<i64: 16, 32>}, {transform_indices = @transform_5, window_bounds = array<i64: 16, 32>}]} {
    %c0 = arith.constant 0 : index
    %c0_0 = arith.constant 0 : index
    %0 = vector.load %arg1[%c0, %c0_0] : memref<16x32xbf16, #tpu.memory_space<vmem>>, vector<16x32xbf16>
    %c0_1 = arith.constant 0 : index
    %c0_2 = arith.constant 0 : index
    %1 = vector.load %arg2[%c0_1, %c0_2] : memref<32x32xbf16, #tpu.memory_space<vmem>>, vector<32x32xbf16>
    %cst = arith.constant dense<0.000000e+00> : vector<16x32xf32>
    %2 = tpu.matmul %0, %1, %cst {dimension_numbers = #tpu.dot_dimension_numbers<[1], [0], [0], [1], [0, 0, 1, 1], [], []>} : vector<16x32xbf16>, vector<32x32xbf16>, vector<16x32xf32> -> vector<16x32xf32>
    %cst_3 = arith.constant 5.000000e-01 : f32
    %3 = vector.broadcast %cst_3 : f32 to vector<16x32xf32>
    %4 = arith.mulf %2, %3 : vector<16x32xf32>
    %c0_4 = arith.constant 0 : index
    %c0_5 = arith.constant 0 : index
    %5 = vector.load %arg3[%c0_4, %c0_5] : memref<16x32xbf16, #tpu.memory_space<vmem>>, vector<16x32xbf16>
    %6 = arith.extf %5 : vector<16x32xbf16> to vector<16x32xf32>
    %7 = arith.addf %4, %6 : vector<16x32xf32>
    %8 = arith.truncf %7 : vector<16x32xf32> to vector<16x32xbf16>
    %c0_6 = arith.constant 0 : index
    %c0_7 = arith.constant 0 : index
    %9 = vector.load %arg5[%c0_6, %c0_7] : memref<16x32xbf16, #tpu.memory_space<vmem>>, vector<16x32xbf16>
    tpu.vector_store %arg5[%c0_6, %c0_7], %8 {strides = array<i32>} : memref<16x32xbf16, #tpu.memory_space<vmem>>, vector<16x32xbf16>,
    %10 = arith.mulf %7, %7 : vector<16x32xf32>
    %cst_8 = arith.constant dense<0.000000e+00> : vector<16xf32>
    %11 = vector.multi_reduction <add>, %10, %cst_8 [1] : vector<16x32xf32> to vector<16xf32>
    %12 = vector.shape_cast %11 : vector<16xf32> to vector<16x1xf32>
    %cst_9 = arith.constant 3.200000e+01 : f32
    %13 = vector.broadcast %cst_9 : f32 to vector<16x1xf32>
    %14 = arith.divf %12, %13 : vector<16x1xf32>
    %cst_10 = arith.constant 9.99999997E-7 : f32
    %15 = vector.broadcast %cst_10 : f32 to vector<16x1xf32>
    %16 = arith.addf %14, %15 : vector<16x1xf32>
    %17 = math.rsqrt %16 : vector<16x1xf32>
    %18 = vector.broadcast %17 : vector<16x1xf32> to vector<16x32xf32>
    %19 = arith.mulf %7, %18 : vector<16x32xf32>
    %c0_11 = arith.constant 0 : index
    %c0_12 = arith.constant 0 : index
    %20 = vector.load %arg4[%c0_11, %c0_12] : memref<1x32xbf16, #tpu.memory_space<vmem>>, vector<1x32xbf16>
    %21 = arith.extf %20 : vector<1x32xbf16> to vector<1x32xf32>
    %22 = vector.broadcast %21 : vector<1x32xf32> to vector<16x32xf32>
    %23 = arith.mulf %19, %22 : vector<16x32xf32>
    %cst_13 = arith.constant 5.000000e-01 : f32
    %24 = vector.broadcast %cst_13 : f32 to vector<16x32xf32>
    %25 = arith.mulf %23, %24 : vector<16x32xf32>
    %26 = arith.truncf %25 : vector<16x32xf32> to vector<16x32xbf16>
    %c0_14 = arith.constant 0 : index
    %c0_15 = arith.constant 0 : index
    %27 = vector.load %arg6[%c0_14, %c0_15] : memref<16x32xbf16, #tpu.memory_space<vmem>>, vector<16x32xbf16>
    tpu.vector_store %arg6[%c0_14, %c0_15], %26 {strides = array<i32>} : memref<16x32xbf16, #tpu.memory_space<vmem>>, vector<16x32xbf16>,
    return
  }
  func.func @transform_0(%arg0: i32) -> (i32, i32) {
    %c0_i32 = arith.constant 0 : i32
    %c0_i32_0 = arith.constant 0 : i32
    return %arg0, %c0_i32 : i32, i32
  }
  func.func @transform_1(%arg0: i32) -> (i32, i32) {
    %c0_i32 = arith.constant 0 : i32
    %c0_i32_0 = arith.constant 0 : i32
    %c0_i32_1 = arith.constant 0 : i32
    return %c0_i32, %c0_i32_0 : i32, i32
  }
  func.func @transform_2(%arg0: i32) -> (i32, i32) {
    %c0_i32 = arith.constant 0 : i32
    %c0_i32_0 = arith.constant 0 : i32
    return %arg0, %c0_i32 : i32, i32
  }
  func.func @transform_3(%arg0: i32) -> (i32, i32) {
    %c0_i32 = arith.constant 0 : i32
    %c0_i32_0 = arith.constant 0 : i32
    %c0_i32_1 = arith.constant 0 : i32
    return %c0_i32, %c0_i32_0 : i32, i32
  }
  func.func @transform_4(%arg0: i32) -> (i32, i32) {
    %c0_i32 = arith.constant 0 : i32
    %c0_i32_0 = arith.constant 0 : i32
    return %arg0, %c0_i32 : i32, i32
  }
  func.func @transform_5(%arg0: i32) -> (i32, i32) {
    %c0_i32 = arith.constant 0 : i32
    %c0_i32_0 = arith.constant 0 : i32
    return %arg0, %c0_i32 : i32, i32
  }
}

</mosaic_0001>

<bundles_post_ra>
// kernel: cached_mistral_layer.4
= control target key start
LH: loop header
LB: loop body
LE: loop exit
PB: predicated region body
PF: predicated region fallthrough
CT: control target
= control target key end

     0   :  { %vm30_vm0 = vcmask 261120   ;;  %v345_v8 = vmov 0.0   ;;  %vm346_vm1 = vmmov 0   ;;  %v48_v16 = vlaneseq  ;;  %s443_s0 = inlined_call_operand.vmem [shape: bf16[16,32], index: 0, kind: input, shape index: {}]   ;;  %s444_s2 = inlined_call_operand.vmem [shape: bf16[32,32], index: 2, kind: input, shape index: {}]   ;;  %s445_s3 = inlined_call_operand.vmem [shape: bf16[32,16], index: 3, kind: input, shape index: {}]   ;;  %s446_s4 = inlined_call_operand.vmem [shape: bf16[32,16], index: 4, kind: input, shape index: {}]   ;;  %s447_s1 = inlined_call_operand.vmem [shape: bf16[1,32], index: 1, kind: input, shape index: {}]   ;;  %s448_s5 = inlined_call_operand.vmem [shape: bf16[16,32], index: 5, kind: output, shape index: {0}]   ;;  %s449_s6 = inlined_call_operand.vmem [shape: bf16[16,16], index: 6, kind: output, shape index: {1}]   ;;  %s450_s7 = inlined_call_operand.vmem [shape: bf16[16,16], index: 7, kind: output, shape index: {2}]  }
   0x1   :  { %v297_v0 = vld [vmem:[%s443_s0] sm:$0xff]   ;;  %309 = vmatprep.subr.bf16.mxu0 %v345_v8  ;;  %317 = vmatprep.subr.bf16.mxu1 %v345_v8  ;;  %v337_v10 = vld [vmem:[%s444_s2 + $0x8] sm:$0xff]   ;;  %vm125_vm2 = vcmask 257024   ;;  %vm193_vm3 = vcmask 125952  }
   0x2   :  { %v298_v1 = vunpack.c.l.bf16 %v297_v0  ;;  %v299_v2 = vunpack.c.h.bf16 %v297_v0  ;;  %v335_v7 = vld [vmem:[%s444_s2] sm:$0xff]   ;;  %313 = vmatprep.mubr.msk.bf16.mxu0 %vm346_vm1, %v345_v8  ;;  %v338_v11 = vld [vmem:[%s445_s3 + $0x8] sm:$0xff]   ;;  %321 = vmatprep.mubr.msk.bf16.mxu1 %vm346_vm1, %v345_v8  ;;  %v49_v19 = vshrl.u32 %v48_v16, 7 }
   0x3   :  { %v336_v9 = vld [vmem:[%s445_s3] sm:$0xff]   ;;  %310 = vmatpush3.bf16.msra.mxu0 %v335_v7  ;;  %v340_v34 = vld [vmem:[%s446_s4 + $0x8] sm:$0xff]  }
   0x4   :  { %v28_v3 = vmul.f32 %v298_v1, %v298_v1  ;;  %v29_v4 = vmul.f32 %v299_v2, %v299_v2  ;;  %318 = vmatpush3.bf16.msra.mxu1 %v336_v9  ;;  %311 = vmatprep.subr.bf16.mxu0 %v345_v8  ;;  %v46_v20 = vld [vmem:[%s447_s1] sm:$0x1]  ;;  %v50_v22 = vsub.s32 0, %v49_v19 }
   0x5   :  { %319 = vmatprep.subr.bf16.mxu1 %v345_v8  ;;  %v47_v21 = vunpack.c.l.bf16 %v46_v20  ;;  %v339_v32 = vld [vmem:[%s446_s4] sm:$0xff]  }
   0x6   :  { %v31_v5 = vsel %vm30_vm0, %v28_v3, 0.0  ;;  %v34_v6 = vsel %vm30_vm0, %v29_v4, 0.0 }
   0x7   :  { %32 = vadd.xlane.f32.xlu0 %v31_v5  ;;  %312 = vmatpush3.bf16.msra.mxu0 %v337_v10  ;;  %v51_v25 = vrot.slane %v47_v21, %v50_v22 }
   0x8   :  { %320 = vmatpush3.bf16.msra.mxu1 %v338_v11  ;;  %325 = vmatprep.subr.bf16.mxu0 %v345_v8 }
   0xb   :  { %35 = vadd.xlane.f32.xlu0 %v34_v6 }
  0x94   :  { %v33_v12 = vpop.xlane.xlu0 %32 }
  0x95   :  { %v38_v13 = vmul.f32 0.03125, %v33_v12 }
  0x97   :  { %v40_v14 = vadd.f32 1e-06, %v38_v13 }
  0x98   :  { %v36_v15 = vpop.xlane.xlu0 %35 }
  0x99   :  { %341 = vrsqrt.f32 %v40_v14  ;;  %v39_v17 = vmul.f32 0.03125, %v36_v15 }
  0x9b   :  { %v41_v18 = vadd.f32 1e-06, %v39_v17 }
  0x9d   :  { %343 = vrsqrt.f32 %v41_v18 }
  0xa3   :  { %v342_v23 = vpop.eup %341 }
  0xa4   :  { %v44_v24 = vmul.f32 %v342_v23, %v298_v1 }
  0xa6   :  { %v52_v28 = vmul.f32 %v51_v25, %v44_v24 }
  0xa7   :  { %v344_v26 = vpop.eup %343 }
  0xa8   :  { %v45_v27 = vmul.f32 %v344_v26, %v299_v2  ;;  %v54_v30 = vmul.f32 0.5, %v52_v28 }
  0xaa   :  { %v53_v29 = vmul.f32 %v51_v25, %v45_v27 }
  0xac   :  { %v55_v31 = vmul.f32 0.5, %v53_v29 }
  0xae   :  { %v56_v33 = vpack.c.bf16 %v55_v31, %v54_v30 }
  0xb0   :  { %314 = vmatmul.mubr.msk.bf16.vlgmr.msra.gmra.mrb[0].mxu0 %vm30_vm0, %v56_v33  ;;  %322 = vmatmul.mubr.msk.bf16.vlgmr.msra.gmra.mrb[0].mxu1 %vm30_vm0, %v56_v33 }
  0xb1   :  { %326 = vmatpush3.bf16.msra.mxu0 %v339_v32  ;;  %329 = vmatprep.mubr.msk.bf16.mxu0 %vm346_vm1, %v345_v8 }
  0xb2   :  { %327 = vmatprep.subr.bf16.mxu0 %v345_v8 }
  0xb5   :  { %328 = vmatpush3.bf16.msra.mxu0 %v340_v34 }
  0xb8   :  { %330 = vmatmul.mubr.msk.bf16.vlgmr.msra.gmra.mrb[4].mxu0 %vm30_vm0, %v56_v33 }
 0x183   :  { %v110_v35 = vpop.f32.mrb[0].mxu0  ;;  %v178_v36 = vpop.f32.mrb[0].mxu1 }
 0x184   :  { %v290_v37 = vpack.c.bf16 %v110_v35, %v110_v35  ;;  %v292_v38 = vpack.c.bf16 %v178_v36, %v178_v36  ;;  %v315_v39 = vpop.f32.mrb[1].mxu0  ;;  %v323_v40 = vpop.f32.mrb[1].mxu1 }
 0x185   :  { %v113_v41 = vpop.f32.mrb[2].mxu0  ;;  %v181_v42 = vpop.f32.mrb[2].mxu1 }
 0x186   :  { %126 = vst.msk [vmem:[%s448_s5] sm:$0xf] %vm125_vm2, %v290_v37  ;;  %v291_v43 = vpack.c.bf16 %v113_v41, %v113_v41  ;;  %v293_v44 = vpack.c.bf16 %v181_v42, %v181_v42  ;;  %v316_v45 = vpop.f32.mrb[3].mxu0  ;;  %v324_v46 = vpop.f32.mrb[3].mxu1 }
 0x187   :  { %194 = vst.msk [vmem:[%s449_s6] sm:$0xf] %vm193_vm3, %v292_v38 }
 0x188   :  { %127 = vst.msk [vmem:[%s448_s5 + $0x4] sm:$0xf] %vm125_vm2, %v291_v43 }
 0x189   :  { %195 = vst.msk [vmem:[%s449_s6 + $0x4] sm:$0xf] %vm193_vm3, %v293_v44 }
 0x18b   :  { %v246_v47 = vpop.f32.mrb[4].mxu0 }
 0x18c   :  { %v294_v48 = vpack.c.bf16 %v246_v47, %v246_v47  ;;  %v331_v49 = vpop.f32.mrb[5].mxu0 }
 0x18d   :  { %v249_v50 = vpop.f32.mrb[6].mxu0 }
 0x18e   :  { %261 = vst.msk [vmem:[%s450_s7] sm:$0xf] %vm193_vm3, %v294_v48  ;;  %v295_v51 = vpack.c.bf16 %v249_v50, %v249_v50  ;;  %v332_v52 = vpop.f32.mrb[7].mxu0 }
 0x190   :  { %262 = vst.msk [vmem:[%s450_s7 + $0x4] sm:$0xf] %vm193_vm3, %v295_v51 }

// kernel: cached_mistral_layer.5
= control target key start
LH: loop header
LB: loop body
LE: loop exit
PB: predicated region body
PF: predicated region fallthrough
CT: control target
= control target key end

     0   :  { %s532_s18 = smov 0   ;;  %s572_s0 = inlined_call_operand.vmem [shape: bf16[8,8,8], index: 0, kind: input, shape index: {}]   ;;  %s573_s1 = inlined_call_operand.vmem [shape: bf16[8,8,8], index: 1, kind: input, shape index: {}]   ;;  %s574_s2 = inlined_call_operand.vmem [shape: bf16[8,8,8], index: 2, kind: input, shape index: {}]   ;;  %s575_s3 = inlined_call_operand.vmem [shape: f32[8,8], index: 3, kind: input, shape index: {}]   ;;  %s576_s4 = inlined_call_operand.vmem [shape: f32[8,8], index: 4, kind: input, shape index: {}]   ;;  %s577_s5 = inlined_call_operand.vmem [shape: bf16[8,8,8], index: 5, kind: output, shape index: {}]  }
   0x1 LB: > { %s449_s19 = sadd.s32 4294967295, %s498_s18   ;;  %p453_p0 = scmp.ge.s32.totalorder %s498_s18, 1  ;;  %s498_s18 = sphi %s532_s18, %s15_s18  }
   0x2   : > { %p204_p1 = scmp.lt.s32.totalorder %s498_s18, 9 }
   0x4   : > { %p205_p2 = pnand %p453_p0, %p204_p1 }
   0x5   : > { %p238_p3 = scmp.lt.s32.totalorder (!%p205_p2), %s449_s19, 7  ;;  %v500_v0 = vmov (!%p205_p2), 0.0   ;;  %vm501_vm0 = vmmov (!%p205_p2), 0   ;;  %vm257_vm1 = vcmask (!%p205_p2), 64512   ;;  %v305_v5 = vld [vmem:[%s575_s3] sm:$0xff] (!%p205_p2)  ;;  %vm325_vm2 = vcmask (!%p205_p2), 1043456  }
   0x6   : > { %208 = sbr.rel (%p205_p2) target bundleno = 774 (0x306), region = 40  ;;  %466 = vmatprep.subr.bf16.mxu0 (!%p205_p2), %v500_v0  ;;  %468 = vmatprep.mubr.msk.bf16.mxu0 (!%p205_p2), %vm501_vm0, %v500_v0  ;;  %v307_v9 = vld [vmem:[%s576_s4] sm:$0xff] (!%p205_p2)  ;;  %vm370_vm3 = vcmask (!%p205_p2), 60416  }
   0x7   : > { %472 = vmatprep.subr.bf16.mxu1 (!%p205_p2), %v500_v0  ;;  %474 = vmatprep.mubr.msk.bf16.mxu1 (!%p205_p2), %vm501_vm0, %v500_v0 }
   0xd   : > { %s579_s19 = smov (!%p238_p3, %s449_s19), 7 }
   0xe   : > { %s540_s20 = sshll.u32 %s579_s19, 2 }
   0xf   : > { %s245_s23 = scalar_lea.vmem %s573_s1, %s540_s20  ;;  %s241_s26 = scalar_lea.vmem %s572_s0, %s540_s20 }
  0x10   : > { %v256_v1 = vld [vmem:[%s245_s23] sm:$0xf]  ;;  %s249_s8 = scalar_lea.vmem %s574_s2, %s540_s20  ;;  %s253_s11 = scalar_lea.vmem %s577_s5, %s540_s20 }
  0x11   : > { %v262_v2 = vsel %vm257_vm1, %v256_v1, 0  ;;  %v255_v3 = vld [vmem:[%s241_s26] sm:$0xf] }
  0x12   : > { %467 = vmatpush3.bf16.xpose.msra.mxu0 %v262_v2  ;;  %v321_v19 = vld [vmem:[%s249_s8] sm:$0xf] }
  0x13   : > { %v327_v20 = vsel %vm325_vm2, %v321_v19, 0 }
  0x14   : > { %473 = vmatpush3.bf16.msra.mxu1 %v327_v20 }
  0x19   : > { %469 = vmatmul.mubr.msk.bf16.vlgmr.msra.gmra.mrb[0].mxu0 %vm257_vm1, %v255_v3 }
  0xec   : > { %v298_v4 = vpop.f32.mrb[0].mxu0 }
  0xed   : > { %v304_v6 = vmul.f32 0.35355338, %v298_v4  ;;  %v470_v7 = vpop.f32.mrb[1].mxu0 }
  0xee   : > { %v301_v8 = vpop.f32.mrb[2].mxu0 }
  0xef   : > { %v306_v10 = vmul.f32 %v305_v5, %v304_v6  ;;  %v471_v11 = vpop.f32.mrb[3].mxu0 }
  0xf1   : > { %v308_v12 = vadd.f32 %v307_v9, %v306_v10 }
  0xf3   : > { %v309_v13 = vsel %vm257_vm1, %v308_v12, -inf }
  0xf4   : > { %310 = vmax.xlane.f32.xlu0 %v309_v13 }
 0x181   : > { %v311_v14 = vpop.xlane.xlu0 %310 }
 0x182   : > { %v312_v15 = vsub.f32 %v308_v12, %v311_v14 }
 0x184   : > { %v313_v16 = vmul.f32 1.442695, %v312_v15 }
 0x186   : > { %488 = vpow2.f32 %v313_v16 }
 0x190   : > { %v489_v17 = vpop.eup %488 }
 0x191   : > { %v315_v18 = vsel %vm257_vm1, %v489_v17, 0.0 }
 0x192   : > { %316 = vadd.xlane.f32.xlu0 %v315_v18 }
 0x21f   : > { %v317_v21 = vpop.xlane.xlu0 %316 }
 0x220   : > { %490 = vrcp.f32 %v317_v21 }
 0x22a   : > { %v491_v22 = vpop.eup %490 }
 0x22b   : > { %v319_v23 = vmul.f32 %v491_v22, %v489_v17 }
 0x22d   : > { %v320_v24 = vpack.c.bf16 %v319_v23, %v319_v23 }
 0x22f   : > { %475 = vmatmul.mubr.msk.bf16.vlgmr.msra.gmra.mrb[0].mxu1 %vm257_vm1, %v320_v24 }
 0x302   : > { %v363_v25 = vpop.f32.mrb[0].mxu1 }
 0x303   : > { %v369_v26 = vpack.c.bf16 %v363_v25, %v363_v25  ;;  %v476_v27 = vpop.f32.mrb[1].mxu1 }
 0x304   : > { %v366_v28 = vpop.f32.mrb[2].mxu1 }
 0x305   : > { %371 = vst.msk [vmem:[%s253_s11] sm:$0xf] %vm370_vm3, %v369_v26  ;;  %v477_v29 = vpop.f32.mrb[3].mxu1 }
 0x306 PF: > { %s15_s18 = sadd.s32 1, %s498_s18  }
 0x307   : > { %p12_p4 = scmp.ge.s32.totalorder %s15_s18, 10  }
 0x309   :  { %14 = sbr.rel (!%p12_p4) target bundleno = 1 (0x1), region = 76 }

// kernel: cached_mistral_layer.6
= control target key start
LH: loop header
LB: loop body
LE: loop exit
PB: predicated region body
PF: predicated region fallthrough
CT: control target
= control target key end

     0   :  { %v188_v0 = vmov 0.0   ;;  %vm189_vm0 = vmmov 0   ;;  %vm43_vm1 = vcmask 261120   ;;  %vm104_vm2 = vcmask 257024   ;;  %s254_s1 = inlined_call_operand.vmem [shape: bf16[32,32], index: 1, kind: input, shape index: {}]   ;;  %s255_s0 = inlined_call_operand.vmem [shape: bf16[16,32], index: 0, kind: input, shape index: {}]   ;;  %s256_s2 = inlined_call_operand.vmem [shape: bf16[16,32], index: 2, kind: input, shape index: {}]   ;;  %s257_s4 = inlined_call_operand.vmem [shape: bf16[16,32], index: 4, kind: output, shape index: {0}]   ;;  %s258_s3 = inlined_call_operand.vmem [shape: bf16[1,32], index: 3, kind: input, shape index: {}]   ;;  %s259_s5 = inlined_call_operand.vmem [shape: bf16[16,32], index: 5, kind: output, shape index: {1}]  }
   0x1   :  { %171 = vmatprep.subr.bf16.mxu0 %v188_v0  ;;  %v181_v1 = vld [vmem:[%s254_s1] sm:$0xff]   ;;  %175 = vmatprep.mubr.msk.bf16.mxu0 %vm189_vm0, %v188_v0  ;;  %v182_v2 = vld [vmem:[%s254_s1 + $0x8] sm:$0xff]   ;;  %v126_v23 = vlaneseq }
   0x2   :  { %172 = vmatpush3.bf16.msra.mxu0 %v181_v1  ;;  %v183_v3 = vld [vmem:[%s255_s0] sm:$0xff]  }
   0x3   :  { %173 = vmatprep.subr.bf16.mxu0 %v188_v0  ;;  %v165_v4 = vld [vmem:[%s256_s2] sm:$0xff]   ;;  %v127_v27 = vshrl.u32 %v126_v23, 7 }
   0x4   :  { %v166_v5 = vunpack.c.l.bf16 %v165_v4  ;;  %v167_v9 = vunpack.c.h.bf16 %v165_v4  ;;  %v124_v28 = vld [vmem:[%s258_s3] sm:$0x1] }
   0x5   :  { %v125_v30 = vunpack.c.l.bf16 %v124_v28  ;;  %v128_v31 = vsub.s32 0, %v127_v27 }
   0x6   :  { %174 = vmatpush3.bf16.msra.mxu0 %v182_v2 }
   0x7   :  { %v129_v32 = vrot.slane %v125_v30, %v128_v31 }
   0x9   :  { %176 = vmatmul.mubr.msk.bf16.vlgmr.msra.gmra.mrb[0].mxu0 %vm43_vm1, %v183_v3 }
  0xdc   :  { %v81_v6 = vpop.f32.mrb[0].mxu0 }
  0xdd   :  { %v88_v7 = vmul.f32 0.5, %v81_v6  ;;  %v177_v8 = vpop.f32.mrb[1].mxu0 }
  0xde   :  { %v84_v10 = vpop.f32.mrb[2].mxu0 }
  0xdf   :  { %v94_v11 = vadd.f32 %v166_v5, %v88_v7  ;;  %v89_v12 = vmul.f32 0.5, %v84_v10  ;;  %v178_v13 = vpop.f32.mrb[3].mxu0 }
  0xe1   :  { %v160_v14 = vpack.c.bf16 %v94_v11, %v94_v11  ;;  %v95_v15 = vadd.f32 %v167_v9, %v89_v12  ;;  %v107_v16 = vmul.f32 %v94_v11, %v94_v11 }
  0xe3   :  { %105 = vst.msk [vmem:[%s257_s4] sm:$0xf] %vm104_vm2, %v160_v14  ;;  %v161_v17 = vpack.c.bf16 %v95_v15, %v95_v15  ;;  %v109_v18 = vsel %vm43_vm1, %v107_v16, 0.0  ;;  %v108_v19 = vmul.f32 %v95_v15, %v95_v15 }
  0xe4   :  { %110 = vadd.xlane.f32.xlu0 %v109_v18 }
  0xe5   :  { %106 = vst.msk [vmem:[%s257_s4 + $0x4] sm:$0xf] %vm104_vm2, %v161_v17  ;;  %v112_v20 = vsel %vm43_vm1, %v108_v19, 0.0 }
  0xe8   :  { %113 = vadd.xlane.f32.xlu0 %v112_v20 }
 0x171   :  { %v111_v21 = vpop.xlane.xlu0 %110 }
 0x172   :  { %v116_v22 = vmul.f32 0.03125, %v111_v21 }
 0x174   :  { %v118_v24 = vadd.f32 1e-06, %v116_v22 }
 0x175   :  { %v114_v25 = vpop.xlane.xlu0 %113 }
 0x176   :  { %184 = vrsqrt.f32 %v118_v24  ;;  %v117_v26 = vmul.f32 0.03125, %v114_v25 }
 0x178   :  { %v119_v29 = vadd.f32 1e-06, %v117_v26 }
 0x17a   :  { %186 = vrsqrt.f32 %v119_v29 }
 0x180   :  { %v185_v33 = vpop.eup %184 }
 0x181   :  { %v122_v34 = vmul.f32 %v185_v33, %v94_v11 }
 0x183   :  { %v130_v35 = vmul.f32 %v129_v32, %v122_v34 }
 0x184   :  { %v187_v36 = vpop.eup %186 }
 0x185   :  { %v132_v37 = vmul.f32 0.5, %v130_v35  ;;  %v123_v38 = vmul.f32 %v187_v36, %v95_v15 }
 0x187   :  { %v162_v39 = vpack.c.bf16 %v132_v37, %v132_v37  ;;  %v131_v40 = vmul.f32 %v129_v32, %v123_v38 }
 0x189   :  { %142 = vst.msk [vmem:[%s259_s5] sm:$0xf] %vm104_vm2, %v162_v39  ;;  %v133_v41 = vmul.f32 0.5, %v131_v40 }
 0x18b   :  { %v163_v42 = vpack.c.bf16 %v133_v41, %v133_v41 }
 0x18d   :  { %143 = vst.msk [vmem:[%s259_s5 + $0x4] sm:$0xf] %vm104_vm2, %v163_v42 }

// kernel: cached_mistral_layer.7
= control target key start
LH: loop header
LB: loop body
LE: loop exit
PB: predicated region body
PF: predicated region fallthrough
CT: control target
= control target key end

     0   :  { %vm25_vm0 = vcmask 261120   ;;  %v361_v0 = vmov 0.0   ;;  %vm362_vm1 = vmmov 0   ;;  %vm204_vm2 = vcmask 523264   ;;  %s438_s1 = inlined_call_operand.vmem [shape: bf16[32,64], index: 1, kind: input, shape index: {}]   ;;  %s439_s0 = inlined_call_operand.vmem [shape: bf16[16,32], index: 0, kind: input, shape index: {}]   ;;  %s440_s2 = inlined_call_operand.vmem [shape: bf16[32,64], index: 2, kind: input, shape index: {}]   ;;  %s441_s3 = inlined_call_operand.vmem [shape: bf16[64,32], index: 3, kind: input, shape index: {}]   ;;  %s442_s4 = inlined_call_operand.vmem [shape: bf16[16,32], index: 4, kind: input, shape index: {}]   ;;  %s443_s5 = inlined_call_operand.vmem [shape: bf16[16,32], index: 5, kind: output, shape index: {}]  }
   0x1   :  { %314 = vmatprep.subr.bf16.mxu1 %v361_v0  ;;  %v344_v1 = vld [vmem:[%s438_s1] sm:$0xff]   ;;  %318 = vmatprep.mubr.msk.bf16.mxu1 %vm362_vm1, %v361_v0  ;;  %26 = vst.msk [vmem:[#allocation2] sm:$0xff] %vm25_vm0, %v361_v0  ;;  %27 = vst.msk [vmem:[#allocation2 + $0x8] sm:$0xff] %vm25_vm0, %v361_v0  ;;  %v345_v2 = vld [vmem:[%s438_s1 + $0x8] sm:$0xff]   ;;  %vm274_vm3 = vcmask 257024  }
   0x2   :  { %330 = vmatprep.subr.bf16.mxu0 %v361_v0  ;;  %338 = vmatprep.mubr.msk.bf16.mxu0 %vm362_vm1, %v361_v0  ;;  %v346_v3 = vld [vmem:[%s439_s0] sm:$0xff]   ;;  %v348_v5 = vld [vmem:[%s440_s2 + $0x8] sm:$0xff]   ;;  %v351_v8 = vld [vmem:[%s441_s3 + $0x10] sm:$0xff]  }
   0x3   :  { %315 = vmatpush3.bf16.msra.mxu1 %v344_v1  ;;  %v347_v4 = vld [vmem:[%s440_s2] sm:$0xff]   ;;  %v350_v7 = vld [vmem:[%s441_s3 + $0x8] sm:$0xff]   ;;  %v352_v9 = vld [vmem:[%s441_s3 + $0x18] sm:$0xff]  }
   0x4   :  { %316 = vmatprep.subr.bf16.mxu1 %v361_v0  ;;  %v349_v6 = vld [vmem:[%s441_s3] sm:$0xff]  }
   0x5   :  { %331 = vmatpush3.bf16.msra.mxu0 %v349_v6  ;;  %v300_v39 = vld [vmem:[%s442_s4] sm:$0xff]  }
   0x6   :  { %332 = vmatprep.subr.bf16.mxu0 %v361_v0  ;;  %v301_v40 = vunpack.c.l.bf16 %v300_v39  ;;  %v302_v43 = vunpack.c.h.bf16 %v300_v39 }
   0x7   :  { %317 = vmatpush3.bf16.msra.mxu1 %v345_v2 }
   0x8   :  { %322 = vmatprep.subr.bf16.mxu1 %v361_v0  ;;  %v170_v31 = vld [vmem:[#allocation2] sm:$0xff]  ;;  %v171_v33 = vld [vmem:[#allocation2 + $0x8] sm:$0xff] }
   0x9   :  { %333 = vmatpush3.bf16.msra.mxu0 %v350_v7 }
   0xa   :  { %319 = vmatmul.mubr.msk.bf16.vlgmr.msra.gmra.mrb[0].mxu1 %vm25_vm0, %v346_v3  ;;  %334 = vmatprep.subr.bf16.mxu0 %v361_v0 }
   0xb   :  { %323 = vmatpush3.bf16.msra.mxu1 %v347_v4  ;;  %326 = vmatprep.mubr.msk.bf16.mxu1 %vm362_vm1, %v361_v0 }
   0xc   :  { %324 = vmatprep.subr.bf16.mxu1 %v361_v0 }
   0xd   :  { %335 = vmatpush3.bf16.msra.mxu0 %v351_v8 }
   0xe   :  { %336 = vmatprep.subr.bf16.mxu0 %v361_v0 }
   0xf   :  { %325 = vmatpush3.bf16.msra.mxu1 %v348_v5 }
  0x11   :  { %337 = vmatpush3.bf16.msra.mxu0 %v352_v9 }
  0x12   :  { %327 = vmatmul.mubr.msk.bf16.vlgmr.msra.gmra.mrb[4].mxu1 %vm25_vm0, %v346_v3 }
  0xdd   :  { %v89_v10 = vpop.f32.mrb[0].mxu1 }
  0xde   :  { %v288_v11 = vmul.f32 -1.442695, %v89_v10  ;;  %v320_v12 = vpop.f32.mrb[1].mxu1 }
  0xdf   :  { %v92_v13 = vpop.f32.mrb[2].mxu1 }
  0xe0   :  { %353 = vpow2.f32 %v288_v11  ;;  %v289_v14 = vmul.f32 -1.442695, %v92_v13  ;;  %v321_v15 = vpop.f32.mrb[3].mxu1 }
  0xe2   :  { %355 = vpow2.f32 %v289_v14 }
  0xe5   :  { %v146_v16 = vpop.f32.mrb[4].mxu1 }
  0xe6   :  { %v328_v17 = vpop.f32.mrb[5].mxu1 }
  0xe7   :  { %v149_v18 = vpop.f32.mrb[6].mxu1 }
  0xe8   :  { %v329_v19 = vpop.f32.mrb[7].mxu1 }
  0xea   :  { %v354_v20 = vpop.eup %353 }
  0xeb   :  { %v159_v21 = vadd.f32 1.0, %v354_v20 }
  0xec   :  { %v356_v22 = vpop.eup %355 }
  0xed   :  { %357 = vrcp.f32 %v159_v21  ;;  %v160_v23 = vadd.f32 1.0, %v356_v22 }
  0xef   :  { %359 = vrcp.f32 %v160_v23 }
  0xf7   :  { %v358_v24 = vpop.eup %357 }
  0xf8   :  { %v165_v25 = vmul.f32 %v358_v24, %v89_v10 }
  0xf9   :  { %v360_v26 = vpop.eup %359 }
  0xfa   :  { %v166_v27 = vmul.f32 %v360_v26, %v92_v13  ;;  %v167_v28 = vmul.f32 %v165_v25, %v146_v16 }
  0xfc   :  { %v168_v29 = vmul.f32 %v166_v27, %v149_v18 }
  0xfe   :  { %v169_v30 = vpack.c.bf16 %v168_v29, %v167_v28 }
 0x100   :  { %339 = vmatmul.mubr.msk.bf16.vlgmr.msra.gmra.mrb[0].mxu0 %vm204_vm2, %v169_v30 }
 0x1d3   :  { %v242_v32 = vpop.f32.mrb[0].mxu0 }
 0x1d4   :  { %v249_v34 = vadd.f32 %v242_v32, %v170_v31  ;;  %v340_v35 = vpop.f32.mrb[1].mxu0 }
 0x1d5   :  { %v245_v36 = vpop.f32.mrb[2].mxu0 }
 0x1d6   :  { %251 = vst.msk [vmem:[#allocation2] sm:$0xff] %vm25_vm0, %v249_v34  ;;  %v250_v37 = vadd.f32 %v245_v36, %v171_v33  ;;  %v341_v38 = vpop.f32.mrb[3].mxu0 }
 0x1d8   :  { %252 = vst.msk [vmem:[#allocation2 + $0x8] sm:$0xff] %vm25_vm0, %v250_v37 }
 0x1dd   :  { %v256_v41 = vld [vmem:[#allocation2] sm:$0xff] }
 0x1de   :  { %v258_v42 = vmul.f32 0.5, %v256_v41 }
 0x1df   :  { %v257_v44 = vld [vmem:[#allocation2 + $0x8] sm:$0xff] }
 0x1e0   :  { %v264_v45 = vadd.f32 %v301_v40, %v258_v42  ;;  %v259_v46 = vmul.f32 0.5, %v257_v44 }
 0x1e2   :  { %v297_v47 = vpack.c.bf16 %v264_v45, %v264_v45  ;;  %v265_v48 = vadd.f32 %v302_v43, %v259_v46 }
 0x1e4   :  { %275 = vst.msk [vmem:[%s443_s5] sm:$0xf] %vm274_vm3, %v297_v47  ;;  %v298_v49 = vpack.c.bf16 %v265_v48, %v265_v48 }
 0x1e6   :  { %276 = vst.msk [vmem:[%s443_s5 + $0x4] sm:$0xf] %vm274_vm3, %v298_v49 }

</bundles_post_ra>
